<compile_context>
chip_gen: v5e
topology: v5e:2x2
jax: 0.10.0
libtpu: 0.0.40
codegen_flags: <defaults>
</compile_context>

<pallas_src>
import functools

import jax
import jax.numpy as jnp
from jax.experimental import pallas as pl
from jax.experimental.pallas import tpu as pltpu

HIDDEN = 128
LANE = 128


def _round_up(x, m):
    return ((x + m - 1) // m) * m


def _tpu_generation():
    """Best-effort (generation, TensorCores-per-chip) detection; safe fallback."""
    try:
        kind = jax.devices()[0].device_kind.lower()
    except Exception:
        return 0, 1
    gen = 0
    for g in (7, 6, 5, 4, 3):
        if f"v{g}" in kind or f"tpu{g}" in kind:
            gen = g
            break
    num_tc = 2 if gen >= 7 else 1
    return gen, num_tc


def actor_kernel(x_ref, w1_ref, b1_ref, w2_ref, b2_ref, w3_ref, b3_ref, out_ref,
                 *, act_dtype):
    # The dtype cast happens in-kernel, so int8/uint8 states stream over HBM at
    # native width; the 1/128 input scale is already folded into w1.
    # Matmul operands are bf16 (native MXU input); accumulation stays f32.
    x = x_ref[...].astype(jnp.float32).astype(jnp.bfloat16)

    # Linear(n_inputs, 128) + Tanh
    h1 = jnp.dot(x, w1_ref[...], preferred_element_type=jnp.float32) + b1_ref[...]
    h1 = jnp.tanh(h1.astype(act_dtype)).astype(jnp.bfloat16)

    # Linear(128, 128) + Tanh
    h2 = jnp.dot(h1, w2_ref[...], preferred_element_type=jnp.float32) + b2_ref[...]
    h2 = jnp.tanh(h2.astype(act_dtype)).astype(jnp.bfloat16)

    # Linear(128, n_out_padded); padded lanes carry a -1e30 bias so they vanish
    # under the softmax below.
    logits = jnp.dot(h2, w3_ref[...], preferred_element_type=jnp.float32) + b3_ref[...]

    # Numerically stable softmax over the (padded) lane dim; divide -> EUP recip.
    m = jnp.max(logits, axis=-1, keepdims=True)
    e = jnp.exp((logits - m).astype(act_dtype)).astype(jnp.float32)
    inv = pl.reciprocal(jnp.sum(e, axis=-1, keepdims=True), approx=True)
    out_ref[...] = (e * inv).astype(out_ref.dtype)


def prepare_params(params):
    """One-time host-side transform of raw (w1,b1,w2,b2,w3,b3).

    - folds the 1/128 input scale into w1 (done in f32, BEFORE the bf16 cast),
    - casts the weight matrices to bf16 (MXU-native); biases stay f32,
    - zero-pads w3's output dim to a multiple of 128 lanes and pads b3 with a
      large negative so padded logits contribute nothing to the softmax.
    """
    w1, b1, w2, b2, w3, b3 = params
    n_outputs = w3.shape[1]
    lane_out = _round_up(n_outputs, LANE)
    pad = lane_out - n_outputs

    w1 = (jnp.asarray(w1, jnp.float32) * (1.0 / 128.0)).astype(jnp.bfloat16)
    w2 = jnp.asarray(w2, jnp.float32).astype(jnp.bfloat16)
    w3 = jnp.asarray(w3, jnp.float32)
    b3 = jnp.asarray(b3, jnp.float32)
    if pad > 0:
        w3 = jnp.pad(w3, ((0, 0), (0, pad)))
        b3 = jnp.pad(b3, ((0, 0), (0, pad)), constant_values=-1e30)
    w3 = w3.astype(jnp.bfloat16)

    return (
        w1,
        jnp.asarray(b1, jnp.float32),
        w2,
        jnp.asarray(b2, jnp.float32),
        w3,
        b3,  # f32: keeps the -1e30 pad exact
    )


def actor_forward(state, prepped, n_outputs, *, tm=None, out_dtype=jnp.float32):
    """state: (B, n_inputs) any float/int dtype. Returns (B, n_outputs) policy."""
    w1, b1, w2, b2, w3, b3 = prepped
    B, n_inputs = state.shape
    lane_out = w3.shape[1]

    gen, num_tc = _tpu_generation()
    # bf16 tanh/exp only where there is a bf16 EUP (v6e / v7x); f32 elsewhere.
    act_dtype = jnp.bfloat16 if gen >= 6 else jnp.float32

    # Batch tile: large tiles amortize the ~0.35us/step grid overhead; at
    # tm=4096 the in/out double buffers + (tm,128) f32 intermediates stay well
    # inside the 32 MiB scoped VMEM default on all generations (incl. v7x).
    # No wrapper pad: grid = cdiv(B, tm), ragged last block is masked by Pallas.
    if tm is None:
        if B < 8:
            tm = B                              # single full-array block
        else:
            tm = min(4096, (B // 8) * 8)        # largest multiple of 8 <= B
            if num_tc > 1:                      # v7x: give both TCs batch tiles
                if -(-B // tm) < num_tc and B >= 16 * num_tc:
                    tm = max(8, ((B // num_tc) // 8) * 8)
    grid = (pl.cdiv(B, tm),)

    flops = 2 * B * (n_inputs * HIDDEN + HIDDEN * HIDDEN + HIDDEN * lane_out)
    transcendentals = B * (2 * HIDDEN + lane_out)
    bytes_accessed = (
        state.size * state.dtype.itemsize
        + sum(p.size * p.dtype.itemsize for p in prepped)
        + B * lane_out * jnp.dtype(out_dtype).itemsize
    )

    out = pl.pallas_call(
        functools.partial(actor_kernel, act_dtype=act_dtype),
        out_shape=jax.ShapeDtypeStruct((B, lane_out), out_dtype),
        grid=grid,
        in_specs=[
            # streamed per-tile (narrow dtypes stream at native width)
            pl.BlockSpec((tm, n_inputs), lambda i: (i, 0)),
            # weights/biases: constant index_map -> VMEM-resident, no re-DMA
            pl.BlockSpec(w1.shape, lambda i: (0, 0)),
            pl.BlockSpec(b1.shape, lambda i: (0, 0)),
            pl.BlockSpec(w2.shape, lambda i: (0, 0)),
            pl.BlockSpec(b2.shape, lambda i: (0, 0)),
            pl.BlockSpec(w3.shape, lambda i: (0, 0)),
            pl.BlockSpec(b3.shape, lambda i: (0, 0)),
        ],
        out_specs=pl.BlockSpec((tm, lane_out), lambda i: (i, 0)),
        compiler_params=pltpu.CompilerParams(
            dimension_semantics=("parallel",),
        ),
        cost_estimate=pl.CostEstimate(
            flops=flops,
            transcendentals=transcendentals,
            bytes_accessed=bytes_accessed,
        ),
    )(state, w1, b1, w2, b2, w3, b3)

    # Under jit this slice fuses into the consumer; for maximum output-HBM
    # savings pass out_dtype=jnp.bfloat16 (policy probabilities rarely need f32).
    return out[:B, :n_outputs]


def init_params(key, n_inputs, n_outputs, hidden=HIDDEN):
    """Deterministic init mirroring torch.nn.Linear default: U(-1/sqrt(fan_in), 1/sqrt(fan_in))."""
    def linear(key, fan_in, fan_out):
        kw, kb = jax.random.split(key)
        bound = 1.0 / jnp.sqrt(jnp.float32(fan_in))
        w = jax.random.uniform(kw, (fan_in, fan_out), jnp.float32, -bound, bound)
        b = jax.random.uniform(kb, (1, fan_out), jnp.float32, -bound, bound)
        return w, b

    k1, k2, k3 = jax.random.split(key, 3)
    w1, b1 = linear(k1, n_inputs, hidden)
    w2, b2 = linear(k2, hidden, hidden)
    w3, b3 = linear(k3, hidden, n_outputs)
    return (w1, b1, w2, b2, w3, b3)


def reference_forward(state, params):
    """Pure-JAX f32 reference matching the PyTorch module exactly."""
    w1, b1, w2, b2, w3, b3 = params
    x = state.astype(jnp.float32) / 128.0
    h1 = jnp.tanh(x @ w1 + b1)
    h2 = jnp.tanh(h1 @ w2 + b2)
    logits = h2 @ w3 + b3
    return jax.nn.softmax(logits, axis=-1)


if __name__ == "__main__":
    key = jax.random.PRNGKey(0)
    k_state, k_params = jax.random.split(key)

    B, n_inputs, n_outputs = 8, 32, 8
    # Game-like byte-valued observations fed at native narrow width (int8); the
    # float cast and /128 scaling happen inside the kernel / via the w1 fold.
    state = jax.random.randint(
        k_state, (B, n_inputs), 0, 120, dtype=jnp.int32
    ).astype(jnp.int8)

    params = init_params(k_params, n_inputs, n_outputs)
    prepped = prepare_params(params)

    policy = actor_forward(state, prepped, n_outputs)
    policy = jax.block_until_ready(policy)

    assert policy.shape == (B, n_outputs)

    # sanity: softmax rows sum to ~1 (approx reciprocal -> loose tolerance)
    row_sums = jnp.sum(policy, axis=-1)
    assert bool(jnp.allclose(row_sums, jnp.ones_like(row_sums), atol=1e-2))

    # numerical check against the f32 reference (bf16 weights/activations ->
    # loosened tolerance)
    ref = reference_forward(state, params)
    assert bool(jnp.allclose(policy, ref, atol=2.5e-2))

    print("KERNEL_OK")
</pallas_src>

<mosaic_0001>
module attributes {stable_mosaic.version = 11 : i64} {
  func.func @actor_kernel(%arg0: i32, %arg1: memref<8x32xi8, #tpu.memory_space<vmem>>, %arg2: memref<32x128xbf16, #tpu.memory_space<vmem>>, %arg3: memref<1x128xf32, #tpu.memory_space<vmem>>, %arg4: memref<128x128xbf16, #tpu.memory_space<vmem>>, %arg5: memref<1x128xf32, #tpu.memory_space<vmem>>, %arg6: memref<128x128xbf16, #tpu.memory_space<vmem>>, %arg7: memref<1x128xf32, #tpu.memory_space<vmem>>, %arg8: memref<8x128xf32, #tpu.memory_space<vmem>>) attributes {dimension_semantics = [#tpu.dimension_semantics<parallel>], iteration_bounds = array<i64: 1>, scalar_prefetch = 0 : i64, scratch_operands = 0 : i64, tpu.core_type = #tpu.core_type<tc>, window_params = [{transform_indices = @transform_0, window_bounds = array<i64: 8, 32>}, {pipeline_mode = #tpu.pipeline_mode<synchronous>, transform_indices = @transform_1, window_bounds = array<i64: 32, 128>}, {pipeline_mode = #tpu.pipeline_mode<synchronous>, transform_indices = @transform_2, window_bounds = array<i64: 1, 128>}, {pipeline_mode = #tpu.pipeline_mode<synchronous>, transform_indices = @transform_3, window_bounds = array<i64: 128, 128>}, {pipeline_mode = #tpu.pipeline_mode<synchronous>, transform_indices = @transform_4, window_bounds = array<i64: 1, 128>}, {pipeline_mode = #tpu.pipeline_mode<synchronous>, transform_indices = @transform_5, window_bounds = array<i64: 128, 128>}, {pipeline_mode = #tpu.pipeline_mode<synchronous>, transform_indices = @transform_6, window_bounds = array<i64: 1, 128>}, {transform_indices = @transform_7, window_bounds = array<i64: 8, 128>}]} {
    %c0 = arith.constant 0 : index
    %c0_0 = arith.constant 0 : index
    %0 = vector.load %arg1[%c0, %c0_0] : memref<8x32xi8, #tpu.memory_space<vmem>>, vector<8x32xi8>
    %1 = arith.sitofp %0 : vector<8x32xi8> to vector<8x32xf32>
    %2 = arith.truncf %1 : vector<8x32xf32> to vector<8x32xbf16>
    %c0_1 = arith.constant 0 : index
    %c0_2 = arith.constant 0 : index
    %3 = vector.load %arg2[%c0_1, %c0_2] : memref<32x128xbf16, #tpu.memory_space<vmem>>, vector<32x128xbf16>
    %cst = arith.constant dense<0.000000e+00> : vector<8x128xf32>
    %4 = tpu.matmul %2, %3, %cst {dimension_numbers = #tpu.dot_dimension_numbers<[1], [0], [0], [1], [0, 0, 1, 1], [], []>} : vector<8x32xbf16>, vector<32x128xbf16>, vector<8x128xf32> -> vector<8x128xf32>
    %c0_3 = arith.constant 0 : index
    %c0_4 = arith.constant 0 : index
    %5 = vector.load %arg3[%c0_3, %c0_4] : memref<1x128xf32, #tpu.memory_space<vmem>>, vector<1x128xf32>
    %6 = vector.broadcast %5 : vector<1x128xf32> to vector<8x128xf32>
    %7 = arith.addf %4, %6 : vector<8x128xf32>
    %8 = math.tanh %7 : vector<8x128xf32>
    %9 = arith.truncf %8 : vector<8x128xf32> to vector<8x128xbf16>
    %c0_5 = arith.constant 0 : index
    %c0_6 = arith.constant 0 : index
    %10 = vector.load %arg4[%c0_5, %c0_6] : memref<128x128xbf16, #tpu.memory_space<vmem>>, vector<128x128xbf16>
    %cst_7 = arith.constant dense<0.000000e+00> : vector<8x128xf32>
    %11 = tpu.matmul %9, %10, %cst_7 {dimension_numbers = #tpu.dot_dimension_numbers<[1], [0], [0], [1], [0, 0, 1, 1], [], []>} : vector<8x128xbf16>, vector<128x128xbf16>, vector<8x128xf32> -> vector<8x128xf32>
    %c0_8 = arith.constant 0 : index
    %c0_9 = arith.constant 0 : index
    %12 = vector.load %arg5[%c0_8, %c0_9] : memref<1x128xf32, #tpu.memory_space<vmem>>, vector<1x128xf32>
    %13 = vector.broadcast %12 : vector<1x128xf32> to vector<8x128xf32>
    %14 = arith.addf %11, %13 : vector<8x128xf32>
    %15 = math.tanh %14 : vector<8x128xf32>
    %16 = arith.truncf %15 : vector<8x128xf32> to vector<8x128xbf16>
    %c0_10 = arith.constant 0 : index
    %c0_11 = arith.constant 0 : index
    %17 = vector.load %arg6[%c0_10, %c0_11] : memref<128x128xbf16, #tpu.memory_space<vmem>>, vector<128x128xbf16>
    %cst_12 = arith.constant dense<0.000000e+00> : vector<8x128xf32>
    %18 = tpu.matmul %16, %17, %cst_12 {dimension_numbers = #tpu.dot_dimension_numbers<[1], [0], [0], [1], [0, 0, 1, 1], [], []>} : vector<8x128xbf16>, vector<128x128xbf16>, vector<8x128xf32> -> vector<8x128xf32>
    %c0_13 = arith.constant 0 : index
    %c0_14 = arith.constant 0 : index
    %19 = vector.load %arg7[%c0_13, %c0_14] : memref<1x128xf32, #tpu.memory_space<vmem>>, vector<1x128xf32>
    %20 = vector.broadcast %19 : vector<1x128xf32> to vector<8x128xf32>
    %21 = arith.addf %18, %20 : vector<8x128xf32>
    %cst_15 = arith.constant dense<0xFF800000> : vector<8xf32>
    %22 = vector.multi_reduction <maximumf>, %21, %cst_15 [1] : vector<8x128xf32> to vector<8xf32>
    %23 = vector.shape_cast %22 : vector<8xf32> to vector<8x1xf32>
    %24 = vector.broadcast %23 : vector<8x1xf32> to vector<8x128xf32>
    %25 = arith.subf %21, %24 : vector<8x128xf32>
    %26 = math.exp %25 : vector<8x128xf32>
    %cst_16 = arith.constant dense<0.000000e+00> : vector<8xf32>
    %27 = vector.multi_reduction <add>, %26, %cst_16 [1] : vector<8x128xf32> to vector<8xf32>
    %28 = vector.shape_cast %27 : vector<8xf32> to vector<8x1xf32>
    %29 = tpu.reciprocal %28 {approx = true} : vector<8x1xf32> -> vector<8x1xf32>
    %30 = vector.broadcast %29 : vector<8x1xf32> to vector<8x128xf32>
    %31 = arith.mulf %26, %30 : vector<8x128xf32>
    %c0_17 = arith.constant 0 : index
    %c0_18 = arith.constant 0 : index
    %32 = vector.load %arg8[%c0_17, %c0_18] : memref<8x128xf32, #tpu.memory_space<vmem>>, vector<8x128xf32>
    tpu.vector_store %arg8[%c0_17, %c0_18], %31 {strides = array<i32>} : memref<8x128xf32, #tpu.memory_space<vmem>>, vector<8x128xf32>,
    return
  }
  func.func @transform_0(%arg0: i32) -> (i32, i32) {
    %c0_i32 = arith.constant 0 : i32
    %c0_i32_0 = arith.constant 0 : i32
    return %arg0, %c0_i32 : i32, i32
  }
  func.func @transform_1(%arg0: i32) -> (i32, i32) {
    %c0_i32 = arith.constant 0 : i32
    %c0_i32_0 = arith.constant 0 : i32
    %c0_i32_1 = arith.constant 0 : i32
    return %c0_i32, %c0_i32_0 : i32, i32
  }
  func.func @transform_2(%arg0: i32) -> (i32, i32) {
    %c0_i32 = arith.constant 0 : i32
    %c0_i32_0 = arith.constant 0 : i32
    %c0_i32_1 = arith.constant 0 : i32
    return %c0_i32, %c0_i32_0 : i32, i32
  }
  func.func @transform_3(%arg0: i32) -> (i32, i32) {
    %c0_i32 = arith.constant 0 : i32
    %c0_i32_0 = arith.constant 0 : i32
    %c0_i32_1 = arith.constant 0 : i32
    return %c0_i32, %c0_i32_0 : i32, i32
  }
  func.func @transform_4(%arg0: i32) -> (i32, i32) {
    %c0_i32 = arith.constant 0 : i32
    %c0_i32_0 = arith.constant 0 : i32
    %c0_i32_1 = arith.constant 0 : i32
    return %c0_i32, %c0_i32_0 : i32, i32
  }
  func.func @transform_5(%arg0: i32) -> (i32, i32) {
    %c0_i32 = arith.constant 0 : i32
    %c0_i32_0 = arith.constant 0 : i32
    %c0_i32_1 = arith.constant 0 : i32
    return %c0_i32, %c0_i32_0 : i32, i32
  }
  func.func @transform_6(%arg0: i32) -> (i32, i32) {
    %c0_i32 = arith.constant 0 : i32
    %c0_i32_0 = arith.constant 0 : i32
    %c0_i32_1 = arith.constant 0 : i32
    return %c0_i32, %c0_i32_0 : i32, i32
  }
  func.func @transform_7(%arg0: i32) -> (i32, i32) {
    %c0_i32 = arith.constant 0 : i32
    %c0_i32_0 = arith.constant 0 : i32
    return %arg0, %c0_i32 : i32, i32
  }
}

</mosaic_0001>

<bundles_post_ra>
// kernel: tpu_custom_call.1
= control target key start
LH: loop header
LB: loop body
LE: loop exit
PB: predicated region body
PF: predicated region fallthrough
CT: control target
= control target key end

     0   :  { %12 = vsyncpa [#allocation3], 0  ;;  %s633_s0 = inlined_call_operand.hbm [shape: s8[8,32], index: 0, kind: input, shape index: {}]   ;;  %s634_s1 = inlined_call_operand.hbm [shape: bf16[32,128], index: 1, kind: input, shape index: {}]   ;;  %s635_s2 = inlined_call_operand.vmem [shape: f32[1,128], index: 2, kind: input, shape index: {}]   ;;  %s636_s3 = inlined_call_operand.hbm [shape: bf16[128,128], index: 3, kind: input, shape index: {}]   ;;  %s637_s4 = inlined_call_operand.vmem [shape: f32[1,128], index: 4, kind: input, shape index: {}]   ;;  %s638_s5 = inlined_call_operand.hbm [shape: bf16[128,128], index: 5, kind: input, shape index: {}]   ;;  %s639_s6 = inlined_call_operand.vmem [shape: f32[1,128], index: 6, kind: input, shape index: {}]   ;;  %s640_s7 = inlined_call_operand.hbm [shape: f32[8,128], index: 7, kind: output, shape index: {}]  }
   0x1   :  { %13 = vsyncpa [#allocation6], 0 }
   0x2   :  { %14 = vsyncpa [#allocation9], 0  ;;  %s31_s26 = sshll.u32 %s634_s1, 4  ;;  %s32_s26 = int_to_ptr.hbm [resolvable:$true] %s31_s26 }
   0x3   :  { %15 = vsyncpa [#allocation4], 0  ;;  %s562_s27 = smov [#allocation5]   ;;  %s21_s8 = sshll.u32 %s633_s0, 4  ;;  %s22_s8 = int_to_ptr.hbm [resolvable:$true] %s21_s8 }
   0x4   :  { %s33_s28 = sshll.u32 %s562_s27, 4  ;;  %s563_s9 = smov 64   ;;  %s34_s28 = int_to_ptr.vmem [resolvable:$true] %s33_s28 }
   0x5   :  { %s564_s10 = smov 4   ;;  %s565_s11 = smov [#allocation2]  }
   0x6   :  { %39 = dma.hbm_to_vmem [thread:$0]  %s32_s26, 256, %s34_s28, [#allocation6], %s563_s9, %s563_s9, %s564_s10  }
   0x7   :  { %s23_s12 = sshll.u32 %s565_s11, 4  ;;  %s46_s15 = sshll.u32 %s636_s3, 4  ;;  %s24_s12 = int_to_ptr.vmem [resolvable:$true] %s23_s12  ;;  %s47_s15 = int_to_ptr.hbm [resolvable:$true] %s46_s15 }
   0x8   :  { %26 = dma.hbm_to_vmem [thread:$0]  %s22_s8, 32, %s24_s12, [#allocation3]  }
   0x9   :  { %s61_s17 = sshll.u32 %s638_s5, 4  ;;  %s566_s18 = smov [#allocation7]   ;;  %s62_s17 = int_to_ptr.hbm [resolvable:$true] %s61_s17 }
   0xa   :  { %s48_s19 = sshll.u32 %s566_s18, 4  ;;  %s567_s0 = smov [#allocation8]   ;;  %s49_s19 = int_to_ptr.vmem [resolvable:$true] %s48_s19 }
   0xb   :  { %54 = dma.hbm_to_vmem [thread:$0]  %s47_s15, 1024, %s49_s19, [#allocation6], %s563_s9, %s563_s9, %s564_s10  }
   0xc   :  { %s63_s20 = sshll.u32 %s567_s0, 4  ;;  %s64_s20 = int_to_ptr.vmem [resolvable:$true] %s63_s20 }
   0xd   :  { %69 = dma.hbm_to_vmem [thread:$0]  %s62_s17, 1024, %s64_s20, [#allocation9], %s563_s9, %s563_s9, %s564_s10  }
   0xe   :  { %554 = dma.done.wait [#allocation3], 32  }
   0xf   :  { %555 = vsyncadd [#allocation3], 4294967264 }
  0x10   :  { %556 = dma.done.wait [#allocation6], 1280  }
  0x11   :  { %557 = vsyncadd [#allocation6], 4294966016 }
  0x12   :  { %558 = dma.done.wait [#allocation9], 1024  }
  0x13   :  { %559 = vsyncadd [#allocation9], 4294966272  ;;  %v399_v0 = vld [vmem:[#allocation5 + $0x8] sm:$0xff]  ;;  %v89_v1 = vld [vmem:[#allocation2] sm:$0x3]  ;;  %vm113_vm0 = vcmask 261120  }
  0x14   :  { %v90_v2 = vunpack.c.0.s8 %v89_v1  ;;  %v407_v3 = vld [vmem:[#allocation7 + $0x38] sm:$0xff]  ;;  %123 = vmatpush.bf16.msra.mxu0 %v399_v0  ;;  %v398_v4 = vld [vmem:[#allocation5] sm:$0xff]  ;;  %v405_v8 = vld [vmem:[#allocation7 + $0x28] sm:$0xff]  ;;  %s313_s27 = sshll.u32 %s640_s7, 4  ;;  %s314_s27 = int_to_ptr.hbm [resolvable:$true] %s313_s27 }
  0x15   :  { %200 = vmatpush.bf16.msra.mxu1 %v407_v3  ;;  %v406_v6 = vld [vmem:[#allocation7 + $0x30] sm:$0xff]  ;;  %v404_v9 = vld [vmem:[#allocation7 + $0x20] sm:$0xff]  ;;  %v403_v10 = vld [vmem:[#allocation7 + $0x18] sm:$0xff] }
  0x16   :  { %v91_v5 = vcvt.s32.f32 %v90_v2  ;;  %v402_v11 = vld [vmem:[#allocation7 + $0x10] sm:$0xff]  ;;  %v401_v12 = vld [vmem:[#allocation7 + $0x8] sm:$0xff]  ;;  %v400_v13 = vld [vmem:[#allocation7] sm:$0xff] }
  0x17   :  { %v415_v14 = vld [vmem:[#allocation8 + $0x38] sm:$0xff]  ;;  %v414_v15 = vld [vmem:[#allocation8 + $0x30] sm:$0xff]  ;;  %v413_v16 = vld [vmem:[#allocation8 + $0x28] sm:$0xff] }
  0x18   :  { %v92_v7 = vpack.c.bf16 %v91_v5, %v91_v5  ;;  %124 = vmatpush.bf16.msra.mxu0 %v398_v4  ;;  %283 = vmatpush.bf16.msra.mxu2 %v415_v14  ;;  %v412_v17 = vld [vmem:[#allocation8 + $0x20] sm:$0xff]  ;;  %v411_v18 = vld [vmem:[#allocation8 + $0x18] sm:$0xff]  ;;  %v423_v19 = vld [vmem:[%s635_s2] ss:$0 sm:$0xff] }
  0x19   :  { %201 = vmatpush.bf16.msra.mxu1 %v406_v6  ;;  %v410_v25 = vld [vmem:[#allocation8 + $0x10] sm:$0xff]  ;;  %v409_v26 = vld [vmem:[#allocation8 + $0x8] sm:$0xff]  ;;  %v408_v27 = vld [vmem:[#allocation8] sm:$0xff] }
  0x1a   :  { %v424_v28 = vld [vmem:[%s637_s4] ss:$0 sm:$0xff]  ;;  %s568_s4 = smov [#allocation10]  }
  0x1b   :  { %333 = vmatmul.msk.bf16.vlgmr.msra.gmra.mxu0 %vm113_vm0, %v92_v7  ;;  %v425_v34 = vld [vmem:[%s639_s6] ss:$0 sm:$0xff]  ;;  %s311_s24 = sshll.u32 %s568_s4, 4  ;;  %s312_s24 = int_to_ptr.vmem [resolvable:$true] %s311_s24 }
  0x1c   :  { %284 = vmatpush.bf16.msra.mxu2 %v414_v15 }
  0x1d   :  { %202 = vmatpush.bf16.msra.mxu1 %v405_v8 }
  0x20   :  { %285 = vmatpush.bf16.msra.mxu2 %v413_v16 }
  0x21   :  { %203 = vmatpush.bf16.msra.mxu1 %v404_v9 }
  0x24   :  { %286 = vmatpush.bf16.msra.mxu2 %v412_v17 }
  0x25   :  { %204 = vmatpush.bf16.msra.mxu1 %v403_v10 }
  0x28   :  { %287 = vmatpush.bf16.msra.mxu2 %v411_v18 }
  0x29   :  { %205 = vmatpush.bf16.msra.mxu1 %v402_v11 }
  0x2c   :  { %288 = vmatpush.bf16.msra.mxu2 %v410_v25 }
  0x2d   :  { %206 = vmatpush.bf16.msra.mxu1 %v401_v12 }
  0x30   :  { %289 = vmatpush.bf16.msra.mxu2 %v409_v26 }
  0x31   :  { %207 = vmatpush.bf16.msra.mxu1 %v400_v13 }
  0x34   :  { %290 = vmatpush.bf16.msra.mxu2 %v408_v27 }
  0x98   :  { %v126_v20 = vpop.f32.mrf.mxu0 }
  0x99   :  { %v127_v21 = vadd.f32 %v423_v19, %v126_v20 }
  0x9b   :  { %426 = vtanh.f32 %v127_v21 }
  0xa0   :  { %v128_v22 = vpop.f32.mrf.mxu0 }
  0xa1   :  { %v427_v23 = vpop.eup %426 }
  0xa2   :  { %v131_v24 = vpack.c.bf16 %v427_v23, %v427_v23 }
  0xa4   :  { %208 = vmatmul.bf16.vlgmr.msra.gmra.mxu1 %v131_v24 }
 0x121   :  { %v209_v29 = vpop.f32.mrf.mxu1 }
 0x122   :  { %v210_v30 = vadd.f32 %v424_v28, %v209_v29 }
 0x124   :  { %428 = vtanh.f32 %v210_v30 }
 0x129   :  { %v211_v31 = vpop.f32.mrf.mxu1 }
 0x12a   :  { %v429_v32 = vpop.eup %428 }
 0x12b   :  { %v214_v33 = vpack.c.bf16 %v429_v32, %v429_v32 }
 0x12d   :  { %291 = vmatmul.bf16.vlgmr.msra.gmra.mxu2 %v214_v33 }
 0x1b0   :  { %v292_v35 = vpop.f32.mrf.mxu2 }
 0x1b1   :  { %v293_v36 = vadd.f32 %v425_v34, %v292_v35 }
 0x1b3   :  { %296 = vmax.xlane.f32.xlu0 %v293_v36 }
 0x1b8   :  { %v294_v37 = vpop.f32.mrf.mxu2 }
 0x226   :  { %v297_v38 = vpop.xlane.xlu0 %296 }
 0x227   :  { %v298_v39 = vsub.f32 %v293_v36, %v297_v38 }
 0x229   :  { %v299_v40 = vmul.f32 1.442695, %v298_v39 }
 0x22b   :  { %430 = vpow2.f32 %v299_v40 }
 0x231   :  { %v431_v41 = vpop.eup %430 }
 0x232   :  { %301 = vadd.xlane.f32.xlu0 %v431_v41 }
 0x2a5   :  { %v302_v42 = vpop.xlane.xlu0 %301 }
 0x2a6   :  { %432 = vrcp.f32 %v302_v42 }
 0x2ac   :  { %v433_v43 = vpop.eup %432 }
 0x2ad   :  { %v304_v44 = vmul.f32 %v433_v43, %v431_v41 }
 0x2af   :  { %305 = vst [vmem:[#allocation10] sm:$0xff] %v304_v44 }
 0x2b0   :  { %316 = dma.vmem_to_hbm [thread:$0]  %s312_s24, 128, %s314_s27, [#allocation4]  }
 0x2b1   :  { %560 = dma.done.wait [#allocation4], 128  }
 0x2b2   :  { %561 = vsyncadd [#allocation4], 4294967168 }
 0x2b3   :  { %321 = vsyncpa [#allocation3], 1 }
 0x2b4   :  { %322 = vsyncpa [#allocation6], 1 }
 0x2b5   :  { %323 = vsyncpa [#allocation9], 1 }
 0x2b6   :  { %324 = vsyncpa [#allocation4], 1 }

</bundles_post_ra>
